<compile_context>
chip_gen: v7x
topology: tpu7x:2x2x1
jax: 0.10.0
libtpu: 0.0.40
codegen_flags: <defaults>
</compile_context>

<pallas_src>
import numpy as np
import jax
import jax.numpy as jnp
from jax import lax
from jax.experimental import pallas as pl
from jax.experimental.pallas import tpu as pltpu


def _make_kernel(H, W, C, Cout, K, G, eps):
    HW = H * W
    pad = (K - 1) // 2
    cpg = C // G
    cnt = float(HW * cpg)

    def kernel(x_ref, cp_ref, pw_ref, mask_ref, o_ref):
        x = x_ref[0].astype(jnp.float32)            # (C, HW) one sample
        cp = cp_ref[...].astype(jnp.float32)        # (C, K*K + 3)
        pw = pw_ref[...].astype(jnp.float32)        # (Cout, C + 1)
        msk = mask_ref[...].astype(jnp.float32)     # (K*K, HW)

        # ---- depthwise KxK conv, stride 1, zero 'same' padding --------------
        # out[c, h*W+w] = sum_t w[c,t] * x[c, (h+dh)*W + (w+dw)] * valid(h,w,t)
        # Shifts along the flattened lane dim are XLU rolls; the zero halo is
        # applied via the precomputed per-tap validity masks.
        acc = jnp.zeros((C, HW), jnp.float32)
        for kh in range(K):
            for kw in range(K):
                t = kh * K + kw
                d = (kh - pad) * W + (kw - pad)
                w_t = cp[:, t:t + 1]                          # (C, 1)
                if d == 0:
                    acc = acc + x * w_t
                else:
                    xs = pltpu.roll(x, (-d) % HW, axis=1)     # xs[i] = x[i + d]
                    acc = acc + xs * (w_t * msk[t:t + 1, :])
        acc = acc + cp[:, K * K:K * K + 1]                    # depthwise bias

        # ---- GroupNorm(G): stats over (cpg channels x H x W) per sample -----
        csum = jnp.sum(acc, axis=1, keepdims=True)            # (C, 1)
        csq = jnp.sum(acc * acc, axis=1, keepdims=True)       # (C, 1)
        ch = lax.broadcasted_iota(jnp.int32, (C, 1), 0)       # channel index
        mean_c = jnp.zeros((C, 1), jnp.float32)
        var_c = jnp.zeros((C, 1), jnp.float32)
        for g in range(G):                                    # tiny static loop
            gsum = jnp.sum(csum[g * cpg:(g + 1) * cpg, :], keepdims=True)  # (1,1)
            gsq = jnp.sum(csq[g * cpg:(g + 1) * cpg, :], keepdims=True)
            gmean = gsum / cnt
            gvar = jnp.maximum(gsq / cnt - gmean * gmean, 0.0)             # clamp >= 0
            in_g = (ch >= g * cpg) & (ch < (g + 1) * cpg)     # (C, 1) bool
            mean_c = jnp.where(in_g, gmean, mean_c)
            var_c = jnp.where(in_g, gvar, var_c)
        inv_c = lax.rsqrt(var_c + eps)
        gamma_c = cp[:, K * K + 1:K * K + 2]
        beta_c = cp[:, K * K + 2:K * K + 3]
        ynorm = (acc - mean_c) * (inv_c * gamma_c) + beta_c   # (C, HW)

        # ---- 1x1 pointwise conv on the VPU (contraction of C is tiny) -------
        out = jnp.zeros((Cout, HW), jnp.float32)
        for c in range(C):
            out = out + pw[:, c:c + 1] * ynorm[c:c + 1, :]    # (Cout,1)*(1,HW)
        out = out + pw[:, C:C + 1]                            # pointwise bias
        o_ref[0] = out.astype(o_ref.dtype)

    return kernel


def depthwise_conv2d_block(x_nchw, params, *, kernel_size=3, padding=1,
                           stride=1, dilation=1, num_groups=4, eps=1e-5):
    wdw, bdw, gamma, beta, w2, b2 = params
    N, C, H, W = x_nchw.shape
    Cout = w2.shape[0]
    K = kernel_size
    HW = H * W
    assert stride == 1 and dilation == 1, "implemented for stride=1, dilation=1"
    assert K % 2 == 1 and padding == (K - 1) // 2, "implemented for odd 'same' kernels"
    assert C % num_groups == 0
    # TODO(synk): support H*W not a multiple of 128 (pad the flattened spatial
    # dim); the lane-dense tiling + pltpu.roll path below assumes a 128-multiple.
    assert HW % 128 == 0

    # NCHW -> (N, C, H*W): a free reshape. No transpose, no jnp.pad (the halo is
    # handled in-kernel), so no extra HBM passes over the activations.
    x_flat = x_nchw.reshape(N, C, HW)

    # One per-input-channel slab: K*K depthwise taps, dw bias, gamma, beta.
    cparams = jnp.concatenate(
        [wdw.reshape(C, K * K), bdw.reshape(C, 1),
         gamma.reshape(C, 1), beta.reshape(C, 1)], axis=1).astype(jnp.float32)
    # One pointwise slab: w2 columns + bias column.
    pwparams = jnp.concatenate(
        [w2.reshape(Cout, C), b2.reshape(Cout, 1)], axis=1).astype(jnp.float32)

    # Per-tap validity masks (zero padding), shape (K*K, H*W), built host-side.
    hh = np.arange(H)[:, None]
    ww = np.arange(W)[None, :]
    masks = np.zeros((K * K, HW), np.float32)
    for kh in range(K):
        for kw in range(K):
            dh, dw = kh - padding, kw - padding
            valid = ((hh + dh >= 0) & (hh + dh < H) &
                     (ww + dw >= 0) & (ww + dw < W))
            masks[kh * K + kw] = valid.reshape(HW).astype(np.float32)
    masks = jnp.asarray(masks)

    kernel = _make_kernel(H, W, C, Cout, K, num_groups, eps)

    # VMEM budget: double-buffered activation tiles + params, with headroom.
    tile_bytes = 4 * (C * HW + Cout * HW + K * K * HW) \
        + 4 * (C * (K * K + 3) + Cout * (C + 1))
    vmem_limit = int(min(max(4 * tile_bytes + (8 << 20), 16 << 20), 100 << 20))

    out_flat = pl.pallas_call(
        kernel,
        out_shape=jax.ShapeDtypeStruct((N, Cout, HW), x_nchw.dtype),
        grid=(N,),
        in_specs=[
            pl.BlockSpec((1, C, HW), lambda n: (n, 0, 0)),
            pl.BlockSpec((C, K * K + 3), lambda n: (0, 0)),
            pl.BlockSpec((Cout, C + 1), lambda n: (0, 0)),
            pl.BlockSpec((K * K, HW), lambda n: (0, 0)),
        ],
        out_specs=pl.BlockSpec((1, Cout, HW), lambda n: (n, 0, 0)),
        compiler_params=pltpu.CompilerParams(
            dimension_semantics=("parallel",),
            vmem_limit_bytes=vmem_limit),
    )(x_flat, cparams, pwparams, masks)

    # (N, Cout, H*W) is already NCHW-flat; final reshape is free.
    return out_flat.reshape(N, Cout, H, W)


def reference(x_nchw, params, *, num_groups=4, eps=1e-5):
    """Plain-JAX reference matching the PyTorch module semantics."""
    wdw, bdw, gamma, beta, w2, b2 = params
    N, C, H, W = x_nchw.shape
    Cout = w2.shape[0]
    y = lax.conv_general_dilated(
        x_nchw, wdw, window_strides=(1, 1), padding=((1, 1), (1, 1)),
        dimension_numbers=('NCHW', 'OIHW', 'NCHW'), feature_group_count=C)
    y = y + bdw.reshape(1, C, 1, 1)
    yg = y.reshape(N, num_groups, -1)
    mean = yg.mean(axis=2, keepdims=True)
    var = yg.var(axis=2, keepdims=True)
    yn = ((yg - mean) / jnp.sqrt(var + eps)).reshape(N, C, H, W)
    yn = yn * gamma.reshape(1, C, 1, 1) + beta.reshape(1, C, 1, 1)
    out = lax.conv_general_dilated(
        yn, w2, window_strides=(1, 1), padding='VALID',
        dimension_numbers=('NCHW', 'OIHW', 'NCHW'))
    return out + b2.reshape(1, Cout, 1, 1)


if __name__ == "__main__":
    key = jax.random.PRNGKey(0)
    dim_in, dim_out = 4, 8
    N, H, W = 2, 16, 16
    K = 3

    ks = jax.random.split(key, 7)
    x = jax.random.normal(ks[0], (N, dim_in, H, W), jnp.float32)
    # Deterministic synthetic parameters (shapes per nn.Conv2d / nn.GroupNorm):
    wdw = jax.random.normal(ks[1], (dim_in, 1, K, K), jnp.float32) * 0.2      # conv1.weight
    bdw = jax.random.normal(ks[2], (dim_in,), jnp.float32) * 0.1              # conv1.bias
    gamma = 1.0 + 0.1 * jax.random.normal(ks[3], (dim_in,), jnp.float32)      # norm.weight
    beta = 0.1 * jax.random.normal(ks[4], (dim_in,), jnp.float32)             # norm.bias
    w2 = jax.random.normal(ks[5], (dim_out, dim_in, 1, 1), jnp.float32) * 0.2  # conv2.weight
    b2 = jax.random.normal(ks[6], (dim_out,), jnp.float32) * 0.1              # conv2.bias
    params = (wdw, bdw, gamma, beta, w2, b2)

    out = depthwise_conv2d_block(x, params)
    out = jax.block_until_ready(out)

    ref = jax.block_until_ready(reference(x, params))
    assert out.shape == (N, dim_out, H, W)
    assert jnp.allclose(out, ref, atol=1e-4, rtol=1e-4), \
        f"max abs err {jnp.max(jnp.abs(out - ref))}"

    print("KERNEL_OK")
</pallas_src>

<mosaic_0001>
module attributes {stable_mosaic.version = 11 : i64} {
  func.func @kernel(%arg0: i32, %arg1: memref<1x4x256xf32, #tpu.memory_space<vmem>>, %arg2: memref<4x12xf32, #tpu.memory_space<vmem>>, %arg3: memref<8x5xf32, #tpu.memory_space<vmem>>, %arg4: memref<9x256xf32, #tpu.memory_space<vmem>>, %arg5: memref<1x8x256xf32, #tpu.memory_space<vmem>>) attributes {dimension_semantics = [#tpu.dimension_semantics<parallel>], iteration_bounds = array<i64: 2>, scalar_prefetch = 0 : i64, scratch_operands = 0 : i64, tpu.core_type = #tpu.core_type<tc>, window_params = [{transform_indices = @transform_0, window_bounds = array<i64: 1, 4, 256>}, {pipeline_mode = #tpu.pipeline_mode<synchronous>, transform_indices = @transform_1, window_bounds = array<i64: 4, 12>}, {pipeline_mode = #tpu.pipeline_mode<synchronous>, transform_indices = @transform_2, window_bounds = array<i64: 8, 5>}, {pipeline_mode = #tpu.pipeline_mode<synchronous>, transform_indices = @transform_3, window_bounds = array<i64: 9, 256>}, {transform_indices = @transform_4, window_bounds = array<i64: 1, 8, 256>}]} {
    %c0 = arith.constant 0 : index
    %c0_0 = arith.constant 0 : index
    %c0_1 = arith.constant 0 : index
    %0 = vector.load %arg1[%c0, %c0_0, %c0_1] : memref<1x4x256xf32, #tpu.memory_space<vmem>>, vector<1x4x256xf32>
    %1 = vector.shape_cast %0 : vector<1x4x256xf32> to vector<4x256xf32>
    %c0_2 = arith.constant 0 : index
    %c0_3 = arith.constant 0 : index
    %2 = vector.load %arg2[%c0_2, %c0_3] : memref<4x12xf32, #tpu.memory_space<vmem>>, vector<4x12xf32>
    %c0_4 = arith.constant 0 : index
    %c0_5 = arith.constant 0 : index
    %3 = vector.load %arg3[%c0_4, %c0_5] : memref<8x5xf32, #tpu.memory_space<vmem>>, vector<8x5xf32>
    %c0_6 = arith.constant 0 : index
    %c0_7 = arith.constant 0 : index
    %4 = vector.load %arg4[%c0_6, %c0_7] : memref<9x256xf32, #tpu.memory_space<vmem>>, vector<9x256xf32>
    %cst = arith.constant 0.000000e+00 : f32
    %5 = vector.broadcast %cst : f32 to vector<4x256xf32>
    %6 = vector.extract_strided_slice %2 {offsets = [0, 0], sizes = [4, 1], strides = [1, 1]} : vector<4x12xf32> to vector<4x1xf32>
    %c17_i32 = arith.constant 17 : i32
    %7 = tpu.dynamic_rotate %1 by %c17_i32 dim 1 : vector<4x256xf32>, i32 -> vector<4x256xf32>
    %8 = vector.extract_strided_slice %4 {offsets = [0, 0], sizes = [1, 256], strides = [1, 1]} : vector<9x256xf32> to vector<1x256xf32>
    %9 = vector.broadcast %6 : vector<4x1xf32> to vector<4x256xf32>
    %10 = vector.broadcast %8 : vector<1x256xf32> to vector<4x256xf32>
    %11 = arith.mulf %9, %10 : vector<4x256xf32>
    %12 = arith.mulf %7, %11 : vector<4x256xf32>
    %13 = arith.addf %5, %12 : vector<4x256xf32>
    %14 = vector.extract_strided_slice %2 {offsets = [0, 1], sizes = [4, 1], strides = [1, 1]} : vector<4x12xf32> to vector<4x1xf32>
    %c16_i32 = arith.constant 16 : i32
    %15 = tpu.dynamic_rotate %1 by %c16_i32 dim 1 : vector<4x256xf32>, i32 -> vector<4x256xf32>
    %16 = vector.extract_strided_slice %4 {offsets = [1, 0], sizes = [1, 256], strides = [1, 1]} : vector<9x256xf32> to vector<1x256xf32>
    %17 = vector.broadcast %14 : vector<4x1xf32> to vector<4x256xf32>
    %18 = vector.broadcast %16 : vector<1x256xf32> to vector<4x256xf32>
    %19 = arith.mulf %17, %18 : vector<4x256xf32>
    %20 = arith.mulf %15, %19 : vector<4x256xf32>
    %21 = arith.addf %13, %20 : vector<4x256xf32>
    %22 = vector.extract_strided_slice %2 {offsets = [0, 2], sizes = [4, 1], strides = [1, 1]} : vector<4x12xf32> to vector<4x1xf32>
    %c15_i32 = arith.constant 15 : i32
    %23 = tpu.dynamic_rotate %1 by %c15_i32 dim 1 : vector<4x256xf32>, i32 -> vector<4x256xf32>
    %24 = vector.extract_strided_slice %4 {offsets = [2, 0], sizes = [1, 256], strides = [1, 1]} : vector<9x256xf32> to vector<1x256xf32>
    %25 = vector.broadcast %22 : vector<4x1xf32> to vector<4x256xf32>
    %26 = vector.broadcast %24 : vector<1x256xf32> to vector<4x256xf32>
    %27 = arith.mulf %25, %26 : vector<4x256xf32>
    %28 = arith.mulf %23, %27 : vector<4x256xf32>
    %29 = arith.addf %21, %28 : vector<4x256xf32>
    %30 = vector.extract_strided_slice %2 {offsets = [0, 3], sizes = [4, 1], strides = [1, 1]} : vector<4x12xf32> to vector<4x1xf32>
    %c1_i32 = arith.constant 1 : i32
    %31 = tpu.dynamic_rotate %1 by %c1_i32 dim 1 : vector<4x256xf32>, i32 -> vector<4x256xf32>
    %32 = vector.extract_strided_slice %4 {offsets = [3, 0], sizes = [1, 256], strides = [1, 1]} : vector<9x256xf32> to vector<1x256xf32>
    %33 = vector.broadcast %30 : vector<4x1xf32> to vector<4x256xf32>
    %34 = vector.broadcast %32 : vector<1x256xf32> to vector<4x256xf32>
    %35 = arith.mulf %33, %34 : vector<4x256xf32>
    %36 = arith.mulf %31, %35 : vector<4x256xf32>
    %37 = arith.addf %29, %36 : vector<4x256xf32>
    %38 = vector.extract_strided_slice %2 {offsets = [0, 4], sizes = [4, 1], strides = [1, 1]} : vector<4x12xf32> to vector<4x1xf32>
    %39 = vector.broadcast %38 : vector<4x1xf32> to vector<4x256xf32>
    %40 = arith.mulf %1, %39 : vector<4x256xf32>
    %41 = arith.addf %37, %40 : vector<4x256xf32>
    %42 = vector.extract_strided_slice %2 {offsets = [0, 5], sizes = [4, 1], strides = [1, 1]} : vector<4x12xf32> to vector<4x1xf32>
    %c255_i32 = arith.constant 255 : i32
    %43 = tpu.dynamic_rotate %1 by %c255_i32 dim 1 : vector<4x256xf32>, i32 -> vector<4x256xf32>
    %44 = vector.extract_strided_slice %4 {offsets = [5, 0], sizes = [1, 256], strides = [1, 1]} : vector<9x256xf32> to vector<1x256xf32>
    %45 = vector.broadcast %42 : vector<4x1xf32> to vector<4x256xf32>
    %46 = vector.broadcast %44 : vector<1x256xf32> to vector<4x256xf32>
    %47 = arith.mulf %45, %46 : vector<4x256xf32>
    %48 = arith.mulf %43, %47 : vector<4x256xf32>
    %49 = arith.addf %41, %48 : vector<4x256xf32>
    %50 = vector.extract_strided_slice %2 {offsets = [0, 6], sizes = [4, 1], strides = [1, 1]} : vector<4x12xf32> to vector<4x1xf32>
    %c241_i32 = arith.constant 241 : i32
    %51 = tpu.dynamic_rotate %1 by %c241_i32 dim 1 : vector<4x256xf32>, i32 -> vector<4x256xf32>
    %52 = vector.extract_strided_slice %4 {offsets = [6, 0], sizes = [1, 256], strides = [1, 1]} : vector<9x256xf32> to vector<1x256xf32>
    %53 = vector.broadcast %50 : vector<4x1xf32> to vector<4x256xf32>
    %54 = vector.broadcast %52 : vector<1x256xf32> to vector<4x256xf32>
    %55 = arith.mulf %53, %54 : vector<4x256xf32>
    %56 = arith.mulf %51, %55 : vector<4x256xf32>
    %57 = arith.addf %49, %56 : vector<4x256xf32>
    %58 = vector.extract_strided_slice %2 {offsets = [0, 7], sizes = [4, 1], strides = [1, 1]} : vector<4x12xf32> to vector<4x1xf32>
    %c240_i32 = arith.constant 240 : i32
    %59 = tpu.dynamic_rotate %1 by %c240_i32 dim 1 : vector<4x256xf32>, i32 -> vector<4x256xf32>
    %60 = vector.extract_strided_slice %4 {offsets = [7, 0], sizes = [1, 256], strides = [1, 1]} : vector<9x256xf32> to vector<1x256xf32>
    %61 = vector.broadcast %58 : vector<4x1xf32> to vector<4x256xf32>
    %62 = vector.broadcast %60 : vector<1x256xf32> to vector<4x256xf32>
    %63 = arith.mulf %61, %62 : vector<4x256xf32>
    %64 = arith.mulf %59, %63 : vector<4x256xf32>
    %65 = arith.addf %57, %64 : vector<4x256xf32>
    %66 = vector.extract_strided_slice %2 {offsets = [0, 8], sizes = [4, 1], strides = [1, 1]} : vector<4x12xf32> to vector<4x1xf32>
    %c239_i32 = arith.constant 239 : i32
    %67 = tpu.dynamic_rotate %1 by %c239_i32 dim 1 : vector<4x256xf32>, i32 -> vector<4x256xf32>
    %68 = vector.extract_strided_slice %4 {offsets = [8, 0], sizes = [1, 256], strides = [1, 1]} : vector<9x256xf32> to vector<1x256xf32>
    %69 = vector.broadcast %66 : vector<4x1xf32> to vector<4x256xf32>
    %70 = vector.broadcast %68 : vector<1x256xf32> to vector<4x256xf32>
    %71 = arith.mulf %69, %70 : vector<4x256xf32>
    %72 = arith.mulf %67, %71 : vector<4x256xf32>
    %73 = arith.addf %65, %72 : vector<4x256xf32>
    %74 = vector.extract_strided_slice %2 {offsets = [0, 9], sizes = [4, 1], strides = [1, 1]} : vector<4x12xf32> to vector<4x1xf32>
    %75 = vector.broadcast %74 : vector<4x1xf32> to vector<4x256xf32>
    %76 = arith.addf %73, %75 : vector<4x256xf32>
    %cst_8 = arith.constant dense<0.000000e+00> : vector<4xf32>
    %77 = vector.multi_reduction <add>, %76, %cst_8 [1] : vector<4x256xf32> to vector<4xf32>
    %78 = vector.shape_cast %77 : vector<4xf32> to vector<4x1xf32>
    %79 = arith.mulf %76, %76 : vector<4x256xf32>
    %cst_9 = arith.constant dense<0.000000e+00> : vector<4xf32>
    %80 = vector.multi_reduction <add>, %79, %cst_9 [1] : vector<4x256xf32> to vector<4xf32>
    %81 = vector.shape_cast %80 : vector<4xf32> to vector<4x1xf32>
    %82 = tpu.iota {dimensions = array<i32: 0>} : vector<4x1xi32>
    %cst_10 = arith.constant 0.000000e+00 : f32
    %83 = vector.broadcast %cst_10 : f32 to vector<4x1xf32>
    %cst_11 = arith.constant 0.000000e+00 : f32
    %84 = vector.broadcast %cst_11 : f32 to vector<4x1xf32>
    %85 = vector.extract_strided_slice %78 {offsets = [0, 0], sizes = [1, 1], strides = [1, 1]} : vector<4x1xf32> to vector<1x1xf32>
    %86 = vector.shape_cast %85 : vector<1x1xf32> to vector<1x1x1xf32>
    %cst_12 = arith.constant dense<0.000000e+00> : vector<1xf32>
    %87 = vector.multi_reduction <add>, %86, %cst_12 [1, 2] : vector<1x1x1xf32> to vector<1xf32>
    %88 = vector.shape_cast %87 : vector<1xf32> to vector<1x1x1xf32>
    %89 = vector.extract %88[0, 0, 0] : f32 from vector<1x1x1xf32>
    %90 = vector.broadcast %89 : f32 to vector<1x1xf32>
    %91 = vector.extract_strided_slice %81 {offsets = [0, 0], sizes = [1, 1], strides = [1, 1]} : vector<4x1xf32> to vector<1x1xf32>
    %92 = vector.shape_cast %91 : vector<1x1xf32> to vector<1x1x1xf32>
    %cst_13 = arith.constant dense<0.000000e+00> : vector<1xf32>
    %93 = vector.multi_reduction <add>, %92, %cst_13 [1, 2] : vector<1x1x1xf32> to vector<1xf32>
    %94 = vector.shape_cast %93 : vector<1xf32> to vector<1x1x1xf32>
    %95 = vector.extract %94[0, 0, 0] : f32 from vector<1x1x1xf32>
    %96 = vector.broadcast %95 : f32 to vector<1x1xf32>
    %cst_14 = arith.constant 2.560000e+02 : f32
    %97 = vector.broadcast %cst_14 : f32 to vector<1x1xf32>
    %98 = arith.divf %90, %97 : vector<1x1xf32>
    %cst_15 = arith.constant 2.560000e+02 : f32
    %99 = vector.broadcast %cst_15 : f32 to vector<1x1xf32>
    %100 = arith.divf %96, %99 : vector<1x1xf32>
    %101 = arith.mulf %98, %98 : vector<1x1xf32>
    %102 = arith.subf %100, %101 : vector<1x1xf32>
    %cst_16 = arith.constant 0.000000e+00 : f32
    %103 = vector.broadcast %cst_16 : f32 to vector<1x1xf32>
    %104 = arith.maximumf %102, %103 : vector<1x1xf32>
    %c0_i32 = arith.constant 0 : i32
    %105 = vector.broadcast %c0_i32 : i32 to vector<4x1xi32>
    %106 = arith.cmpi sge, %82, %105 : vector<4x1xi32>
    %c1_i32_17 = arith.constant 1 : i32
    %107 = vector.broadcast %c1_i32_17 : i32 to vector<4x1xi32>
    %108 = arith.cmpi slt, %82, %107 : vector<4x1xi32>
    %109 = arith.andi %106, %108 : vector<4x1xi1>
    %110 = vector.shape_cast %98 : vector<1x1xf32> to vector<1x1xf32>
    %111 = vector.broadcast %110 : vector<1x1xf32> to vector<4x1xf32>
    %112 = arith.select %109, %111, %83 : vector<4x1xi1>, vector<4x1xf32>
    %113 = vector.shape_cast %104 : vector<1x1xf32> to vector<1x1xf32>
    %114 = vector.broadcast %113 : vector<1x1xf32> to vector<4x1xf32>
    %115 = arith.select %109, %114, %84 : vector<4x1xi1>, vector<4x1xf32>
    %116 = vector.extract_strided_slice %78 {offsets = [1, 0], sizes = [1, 1], strides = [1, 1]} : vector<4x1xf32> to vector<1x1xf32>
    %117 = vector.shape_cast %116 : vector<1x1xf32> to vector<1x1x1xf32>
    %cst_18 = arith.constant dense<0.000000e+00> : vector<1xf32>
    %118 = vector.multi_reduction <add>, %117, %cst_18 [1, 2] : vector<1x1x1xf32> to vector<1xf32>
    %119 = vector.shape_cast %118 : vector<1xf32> to vector<1x1x1xf32>
    %120 = vector.extract %119[0, 0, 0] : f32 from vector<1x1x1xf32>
    %121 = vector.broadcast %120 : f32 to vector<1x1xf32>
    %122 = vector.extract_strided_slice %81 {offsets = [1, 0], sizes = [1, 1], strides = [1, 1]} : vector<4x1xf32> to vector<1x1xf32>
    %123 = vector.shape_cast %122 : vector<1x1xf32> to vector<1x1x1xf32>
    %cst_19 = arith.constant dense<0.000000e+00> : vector<1xf32>
    %124 = vector.multi_reduction <add>, %123, %cst_19 [1, 2] : vector<1x1x1xf32> to vector<1xf32>
    %125 = vector.shape_cast %124 : vector<1xf32> to vector<1x1x1xf32>
    %126 = vector.extract %125[0, 0, 0] : f32 from vector<1x1x1xf32>
    %127 = vector.broadcast %126 : f32 to vector<1x1xf32>
    %cst_20 = arith.constant 2.560000e+02 : f32
    %128 = vector.broadcast %cst_20 : f32 to vector<1x1xf32>
    %129 = arith.divf %121, %128 : vector<1x1xf32>
    %cst_21 = arith.constant 2.560000e+02 : f32
    %130 = vector.broadcast %cst_21 : f32 to vector<1x1xf32>
    %131 = arith.divf %127, %130 : vector<1x1xf32>
    %132 = arith.mulf %129, %129 : vector<1x1xf32>
    %133 = arith.subf %131, %132 : vector<1x1xf32>
    %cst_22 = arith.constant 0.000000e+00 : f32
    %134 = vector.broadcast %cst_22 : f32 to vector<1x1xf32>
    %135 = arith.maximumf %133, %134 : vector<1x1xf32>
    %c1_i32_23 = arith.constant 1 : i32
    %136 = vector.broadcast %c1_i32_23 : i32 to vector<4x1xi32>
    %137 = arith.cmpi sge, %82, %136 : vector<4x1xi32>
    %c2_i32 = arith.constant 2 : i32
    %138 = vector.broadcast %c2_i32 : i32 to vector<4x1xi32>
    %139 = arith.cmpi slt, %82, %138 : vector<4x1xi32>
    %140 = arith.andi %137, %139 : vector<4x1xi1>
    %141 = vector.shape_cast %129 : vector<1x1xf32> to vector<1x1xf32>
    %142 = vector.broadcast %141 : vector<1x1xf32> to vector<4x1xf32>
    %143 = arith.select %140, %142, %112 : vector<4x1xi1>, vector<4x1xf32>
    %144 = vector.shape_cast %135 : vector<1x1xf32> to vector<1x1xf32>
    %145 = vector.broadcast %144 : vector<1x1xf32> to vector<4x1xf32>
    %146 = arith.select %140, %145, %115 : vector<4x1xi1>, vector<4x1xf32>
    %147 = vector.extract_strided_slice %78 {offsets = [2, 0], sizes = [1, 1], strides = [1, 1]} : vector<4x1xf32> to vector<1x1xf32>
    %148 = vector.shape_cast %147 : vector<1x1xf32> to vector<1x1x1xf32>
    %cst_24 = arith.constant dense<0.000000e+00> : vector<1xf32>
    %149 = vector.multi_reduction <add>, %148, %cst_24 [1, 2] : vector<1x1x1xf32> to vector<1xf32>
    %150 = vector.shape_cast %149 : vector<1xf32> to vector<1x1x1xf32>
    %151 = vector.extract %150[0, 0, 0] : f32 from vector<1x1x1xf32>
    %152 = vector.broadcast %151 : f32 to vector<1x1xf32>
    %153 = vector.extract_strided_slice %81 {offsets = [2, 0], sizes = [1, 1], strides = [1, 1]} : vector<4x1xf32> to vector<1x1xf32>
    %154 = vector.shape_cast %153 : vector<1x1xf32> to vector<1x1x1xf32>
    %cst_25 = arith.constant dense<0.000000e+00> : vector<1xf32>
    %155 = vector.multi_reduction <add>, %154, %cst_25 [1, 2] : vector<1x1x1xf32> to vector<1xf32>
    %156 = vector.shape_cast %155 : vector<1xf32> to vector<1x1x1xf32>
    %157 = vector.extract %156[0, 0, 0] : f32 from vector<1x1x1xf32>
    %158 = vector.broadcast %157 : f32 to vector<1x1xf32>
    %cst_26 = arith.constant 2.560000e+02 : f32
    %159 = vector.broadcast %cst_26 : f32 to vector<1x1xf32>
    %160 = arith.divf %152, %159 : vector<1x1xf32>
    %cst_27 = arith.constant 2.560000e+02 : f32
    %161 = vector.broadcast %cst_27 : f32 to vector<1x1xf32>
    %162 = arith.divf %158, %161 : vector<1x1xf32>
    %163 = arith.mulf %160, %160 : vector<1x1xf32>
    %164 = arith.subf %162, %163 : vector<1x1xf32>
    %cst_28 = arith.constant 0.000000e+00 : f32
    %165 = vector.broadcast %cst_28 : f32 to vector<1x1xf32>
    %166 = arith.maximumf %164, %165 : vector<1x1xf32>
    %c2_i32_29 = arith.constant 2 : i32
    %167 = vector.broadcast %c2_i32_29 : i32 to vector<4x1xi32>
    %168 = arith.cmpi sge, %82, %167 : vector<4x1xi32>
    %c3_i32 = arith.constant 3 : i32
    %169 = vector.broadcast %c3_i32 : i32 to vector<4x1xi32>
    %170 = arith.cmpi slt, %82, %169 : vector<4x1xi32>
    %171 = arith.andi %168, %170 : vector<4x1xi1>
    %172 = vector.shape_cast %160 : vector<1x1xf32> to vector<1x1xf32>
    %173 = vector.broadcast %172 : vector<1x1xf32> to vector<4x1xf32>
    %174 = arith.select %171, %173, %143 : vector<4x1xi1>, vector<4x1xf32>
    %175 = vector.shape_cast %166 : vector<1x1xf32> to vector<1x1xf32>
    %176 = vector.broadcast %175 : vector<1x1xf32> to vector<4x1xf32>
    %177 = arith.select %171, %176, %146 : vector<4x1xi1>, vector<4x1xf32>
    %178 = vector.extract_strided_slice %78 {offsets = [3, 0], sizes = [1, 1], strides = [1, 1]} : vector<4x1xf32> to vector<1x1xf32>
    %179 = vector.shape_cast %178 : vector<1x1xf32> to vector<1x1x1xf32>
    %cst_30 = arith.constant dense<0.000000e+00> : vector<1xf32>
    %180 = vector.multi_reduction <add>, %179, %cst_30 [1, 2] : vector<1x1x1xf32> to vector<1xf32>
    %181 = vector.shape_cast %180 : vector<1xf32> to vector<1x1x1xf32>
    %182 = vector.extract %181[0, 0, 0] : f32 from vector<1x1x1xf32>
    %183 = vector.broadcast %182 : f32 to vector<1x1xf32>
    %184 = vector.extract_strided_slice %81 {offsets = [3, 0], sizes = [1, 1], strides = [1, 1]} : vector<4x1xf32> to vector<1x1xf32>
    %185 = vector.shape_cast %184 : vector<1x1xf32> to vector<1x1x1xf32>
    %cst_31 = arith.constant dense<0.000000e+00> : vector<1xf32>
    %186 = vector.multi_reduction <add>, %185, %cst_31 [1, 2] : vector<1x1x1xf32> to vector<1xf32>
    %187 = vector.shape_cast %186 : vector<1xf32> to vector<1x1x1xf32>
    %188 = vector.extract %187[0, 0, 0] : f32 from vector<1x1x1xf32>
    %189 = vector.broadcast %188 : f32 to vector<1x1xf32>
    %cst_32 = arith.constant 2.560000e+02 : f32
    %190 = vector.broadcast %cst_32 : f32 to vector<1x1xf32>
    %191 = arith.divf %183, %190 : vector<1x1xf32>
    %cst_33 = arith.constant 2.560000e+02 : f32
    %192 = vector.broadcast %cst_33 : f32 to vector<1x1xf32>
    %193 = arith.divf %189, %192 : vector<1x1xf32>
    %194 = arith.mulf %191, %191 : vector<1x1xf32>
    %195 = arith.subf %193, %194 : vector<1x1xf32>
    %cst_34 = arith.constant 0.000000e+00 : f32
    %196 = vector.broadcast %cst_34 : f32 to vector<1x1xf32>
    %197 = arith.maximumf %195, %196 : vector<1x1xf32>
    %c3_i32_35 = arith.constant 3 : i32
    %198 = vector.broadcast %c3_i32_35 : i32 to vector<4x1xi32>
    %199 = arith.cmpi sge, %82, %198 : vector<4x1xi32>
    %c4_i32 = arith.constant 4 : i32
    %200 = vector.broadcast %c4_i32 : i32 to vector<4x1xi32>
    %201 = arith.cmpi slt, %82, %200 : vector<4x1xi32>
    %202 = arith.andi %199, %201 : vector<4x1xi1>
    %203 = vector.shape_cast %191 : vector<1x1xf32> to vector<1x1xf32>
    %204 = vector.broadcast %203 : vector<1x1xf32> to vector<4x1xf32>
    %205 = arith.select %202, %204, %174 : vector<4x1xi1>, vector<4x1xf32>
    %206 = vector.shape_cast %197 : vector<1x1xf32> to vector<1x1xf32>
    %207 = vector.broadcast %206 : vector<1x1xf32> to vector<4x1xf32>
    %208 = arith.select %202, %207, %177 : vector<4x1xi1>, vector<4x1xf32>
    %cst_36 = arith.constant 9.99999974E-6 : f32
    %209 = vector.broadcast %cst_36 : f32 to vector<4x1xf32>
    %210 = arith.addf %208, %209 : vector<4x1xf32>
    %211 = math.rsqrt %210 : vector<4x1xf32>
    %212 = vector.extract_strided_slice %2 {offsets = [0, 10], sizes = [4, 1], strides = [1, 1]} : vector<4x12xf32> to vector<4x1xf32>
    %213 = vector.extract_strided_slice %2 {offsets = [0, 11], sizes = [4, 1], strides = [1, 1]} : vector<4x12xf32> to vector<4x1xf32>
    %214 = vector.broadcast %205 : vector<4x1xf32> to vector<4x256xf32>
    %215 = arith.subf %76, %214 : vector<4x256xf32>
    %216 = arith.mulf %211, %212 : vector<4x1xf32>
    %217 = vector.broadcast %216 : vector<4x1xf32> to vector<4x256xf32>
    %218 = arith.mulf %215, %217 : vector<4x256xf32>
    %219 = vector.broadcast %213 : vector<4x1xf32> to vector<4x256xf32>
    %220 = arith.addf %218, %219 : vector<4x256xf32>
    %cst_37 = arith.constant 0.000000e+00 : f32
    %221 = vector.broadcast %cst_37 : f32 to vector<8x256xf32>
    %222 = vector.extract_strided_slice %3 {offsets = [0, 0], sizes = [8, 1], strides = [1, 1]} : vector<8x5xf32> to vector<8x1xf32>
    %223 = vector.extract_strided_slice %220 {offsets = [0, 0], sizes = [1, 256], strides = [1, 1]} : vector<4x256xf32> to vector<1x256xf32>
    %224 = vector.broadcast %222 : vector<8x1xf32> to vector<8x256xf32>
    %225 = vector.broadcast %223 : vector<1x256xf32> to vector<8x256xf32>
    %226 = arith.mulf %224, %225 : vector<8x256xf32>
    %227 = arith.addf %221, %226 : vector<8x256xf32>
    %228 = vector.extract_strided_slice %3 {offsets = [0, 1], sizes = [8, 1], strides = [1, 1]} : vector<8x5xf32> to vector<8x1xf32>
    %229 = vector.extract_strided_slice %220 {offsets = [1, 0], sizes = [1, 256], strides = [1, 1]} : vector<4x256xf32> to vector<1x256xf32>
    %230 = vector.broadcast %228 : vector<8x1xf32> to vector<8x256xf32>
    %231 = vector.broadcast %229 : vector<1x256xf32> to vector<8x256xf32>
    %232 = arith.mulf %230, %231 : vector<8x256xf32>
    %233 = arith.addf %227, %232 : vector<8x256xf32>
    %234 = vector.extract_strided_slice %3 {offsets = [0, 2], sizes = [8, 1], strides = [1, 1]} : vector<8x5xf32> to vector<8x1xf32>
    %235 = vector.extract_strided_slice %220 {offsets = [2, 0], sizes = [1, 256], strides = [1, 1]} : vector<4x256xf32> to vector<1x256xf32>
    %236 = vector.broadcast %234 : vector<8x1xf32> to vector<8x256xf32>
    %237 = vector.broadcast %235 : vector<1x256xf32> to vector<8x256xf32>
    %238 = arith.mulf %236, %237 : vector<8x256xf32>
    %239 = arith.addf %233, %238 : vector<8x256xf32>
    %240 = vector.extract_strided_slice %3 {offsets = [0, 3], sizes = [8, 1], strides = [1, 1]} : vector<8x5xf32> to vector<8x1xf32>
    %241 = vector.extract_strided_slice %220 {offsets = [3, 0], sizes = [1, 256], strides = [1, 1]} : vector<4x256xf32> to vector<1x256xf32>
    %242 = vector.broadcast %240 : vector<8x1xf32> to vector<8x256xf32>
    %243 = vector.broadcast %241 : vector<1x256xf32> to vector<8x256xf32>
    %244 = arith.mulf %242, %243 : vector<8x256xf32>
    %245 = arith.addf %239, %244 : vector<8x256xf32>
    %246 = vector.extract_strided_slice %3 {offsets = [0, 4], sizes = [8, 1], strides = [1, 1]} : vector<8x5xf32> to vector<8x1xf32>
    %247 = vector.broadcast %246 : vector<8x1xf32> to vector<8x256xf32>
    %248 = arith.addf %245, %247 : vector<8x256xf32>
    %c0_38 = arith.constant 0 : index
    %c0_39 = arith.constant 0 : index
    %c0_40 = arith.constant 0 : index
    %249 = vector.load %arg5[%c0_38, %c0_39, %c0_40] : memref<1x8x256xf32, #tpu.memory_space<vmem>>, vector<1x8x256xf32>
    %250 = vector.shape_cast %249 : vector<1x8x256xf32> to vector<8x256xf32>
    %251 = vector.shape_cast %248 : vector<8x256xf32> to vector<1x8x256xf32>
    tpu.vector_store %arg5[%c0_38, %c0_39, %c0_40], %251 {strides = array<i32>} : memref<1x8x256xf32, #tpu.memory_space<vmem>>, vector<1x8x256xf32>,
    return
  }
  func.func @transform_0(%arg0: i32) -> (i32, i32, i32) {
    %c0_i32 = arith.constant 0 : i32
    %c0_i32_0 = arith.constant 0 : i32
    %c0_i32_1 = arith.constant 0 : i32
    return %arg0, %c0_i32, %c0_i32_0 : i32, i32, i32
  }
  func.func @transform_1(%arg0: i32) -> (i32, i32) {
    %c0_i32 = arith.constant 0 : i32
    %c0_i32_0 = arith.constant 0 : i32
    %c0_i32_1 = arith.constant 0 : i32
    return %c0_i32, %c0_i32_0 : i32, i32
  }
  func.func @transform_2(%arg0: i32) -> (i32, i32) {
    %c0_i32 = arith.constant 0 : i32
    %c0_i32_0 = arith.constant 0 : i32
    %c0_i32_1 = arith.constant 0 : i32
    return %c0_i32, %c0_i32_0 : i32, i32
  }
  func.func @transform_3(%arg0: i32) -> (i32, i32) {
    %c0_i32 = arith.constant 0 : i32
    %c0_i32_0 = arith.constant 0 : i32
    %c0_i32_1 = arith.constant 0 : i32
    return %c0_i32, %c0_i32_0 : i32, i32
  }
  func.func @transform_4(%arg0: i32) -> (i32, i32, i32) {
    %c0_i32 = arith.constant 0 : i32
    %c0_i32_0 = arith.constant 0 : i32
    %c0_i32_1 = arith.constant 0 : i32
    return %arg0, %c0_i32, %c0_i32_0 : i32, i32, i32
  }
}

</mosaic_0001>

<bundles_post_ra>
// kernel: tpu_custom_call.1
= control target key start
LH: loop header
LB: loop body
LE: loop exit
PB: predicated region body
PF: predicated region fallthrough
CT: control target
= control target key end

     0   :  { %9 = vsyncpa [#allocation3], 0  ;;  %s1613_s0 = inlined_call_operand.hbm [shape: f32[2,4,256], index: 0, kind: input, shape index: {}]   ;;  %s1614_s1 = inlined_call_operand.hbm [shape: f32[4,12], index: 1, kind: input, shape index: {}]   ;;  %s1615_s2 = inlined_call_operand.hbm [shape: f32[8,5], index: 2, kind: input, shape index: {}]   ;;  %s1616_s3 = inlined_call_operand.hbm [shape: f32[9,256], index: 3, kind: input, shape index: {}]   ;;  %s1617_s4 = inlined_call_operand.hbm [shape: f32[2,8,256], index: 4, kind: output, shape index: {}]  }
   0x1   :  { %11 = vsyncpa [#allocation3 + $0x1], 0 }
   0x2   :  { %12 = vsyncpa [#allocation6], 0 }
   0x3   :  { %13 = vsyncpa [#allocation9], 0 }
   0x4   :  { %14 = vsyncpa [#allocation4], 0 }
   0x5   :  { %16 = vsyncpa [#allocation4 + $0x1], 0  ;;  %s1187_s15 = smov 0   ;;  %s1189_s16 = smov 0  }
   0x6   :  { %s1191_s17 = smov 0   ;;  %s1193_s18 = smov 0  }
   0x7 LB: > { %s1208_s19 = sadd.s32 4294967295, %s1132_s18   ;;  %s783_s20 = sadd.s32 4294967294, %s1132_s18   ;;  %s1132_s18 = sphi %s1193_s18, %s1644_s18   ;;  %s1128_s17 = sphi %s1191_s17, %s1643_s17   ;;  %s1124_s16 = sphi %s1189_s16, %s1642_s16   ;;  %s1120_s15 = sphi %s1187_s15, %s1641_s15  }
   0x8   : > { %p42_p0 = scmp.ne.s32.totalorder %s1124_s16, %s1120_s15  ;;  %p1618_p1 = scmp.eq.s32.totalorder %s1208_s19, 0 }
   0x9   : > { %p135_p3 = scmp.eq.s32.totalorder %s783_s20, 1  ;;  %p784_p5 = scmp.ge.s32.totalorder %s1132_s18, 1 }
   0xa   : > { %p1217_p4 = por %p1618_p1, %p42_p0  ;;  %p142_p7 = scmp.lt.s32.totalorder %s1132_s18, 3 }
   0xb   : > { %p1222_p6 = por %p135_p3, %p42_p0  ;;  %s1134_s24 = smov [#allocation5]  }
   0xc   : > { %s1621_s21 = scalar_select %p1217_p4, 1, 0 }
   0xd   : > { %s1622_s22 = scalar_select %p1222_p6, 1, 0 }
   0xe   : > { %p1227_p8 = pnand %p784_p5, %p142_p7  ;;  %s155_s25 = sshll.u32 %s1134_s24, 4  ;;  %s156_s25 = int_to_ptr.vmem [resolvable:$true] %s155_s25 }
   0xf   : > { %s1135_s26 = smov [#allocation7]   ;;  %s1136_s29 = smov [#allocation8]  }
  0x10   : > { %s1623_s23 = scalar_select %p1227_p8, 1, 0 }
  0x11   : > { %p839_p10 = pneg %p1227_p8  ;;  %s166_s27 = sshll.u32 %s1135_s26, 4  ;;  %s1240_s27 = int_to_ptr.vmem [resolvable:$true] %s166_s27 }
  0x12   : > { %s176_s30 = sshll.u32 %s1136_s29, 4  ;;  %s944_s7 = scalar_lea.hbm %s1614_s1, 64  ;;  %s1242_s30 = int_to_ptr.vmem [resolvable:$true] %s176_s30 }
  0x13   : > { %p1236_p11 = pnand %p839_p10, %p1618_p1  ;;  %p945_p12 = scmp.ne.s32.totalorder %s1614_s1, %s944_s7 }
  0x14   : > { %p951_p5 = scmp.lt.u32.totalorder %s944_s7, %s1614_s1 }
  0x15   : > { %p1252_p13 = pneg %p1236_p11 }
  0x17   : > { %p947_p0 = pnand %p1252_p13, %p945_p12 }
  0x19   : > { %p948_p3 = pneg %p947_p0 }
  0x1b   : > { %p953_p7 = pnand %p951_p5, %p948_p3 }
  0x1d   : > { %956 = shalt.err (!%p953_p7)
}
  0x1e   : > { %s957_s13 = scalar_lea.vmem %s156_s25, 64  ;;  %p965_p2 = scmp.lt.s32.totalorder %s156_s25, %s156_s25 }
  0x1f   : > { %p958_p10 = scmp.ne.s32.totalorder %s156_s25, %s957_s13  ;;  %p966_p6 = scmp.lt.s32.totalorder %s957_s13, %s957_s13 }
  0x21   : > { %p960_p9 = pnand %p958_p10, %p1252_p13  ;;  %p967_p4 = por %p966_p6, %p965_p2 }
  0x23   : > { %p961_p1 = pneg %p960_p9 }
  0x25   : > { %p968_p8 = pnand %p967_p4, %p961_p1 }
  0x27   : > { %971 = shalt.err (!%p968_p8)
}
  0x28   : > { %842 = dma.hbm_to_vmem [thread:$0]  (!%p1236_p11), %s1614_s1, 64, %s156_s25, [#allocation6]  }
  0x29   : > { %s972_s29 = scalar_lea.hbm %s1615_s2, 128 }
  0x2a   : > { %p973_p9 = scmp.ne.s32.totalorder %s1615_s2, %s972_s29  ;;  %p979_p1 = scmp.lt.u32.totalorder %s972_s29, %s1615_s2 }
  0x2c   : > { %p975_p12 = pnand %p973_p9, %p1252_p13 }
  0x2e   : > { %p976_p2 = pneg %p975_p12 }
  0x30   : > { %p981_p4 = pnand %p979_p1, %p976_p2 }
  0x32   : > { %984 = shalt.err (!%p981_p4)
}
  0x33   : > { %s985_s25 = scalar_lea.vmem %s1240_s27, 128  ;;  %p993_p3 = scmp.lt.s32.totalorder %s1240_s27, %s1240_s27 }
  0x34   : > { %p986_p6 = scmp.ne.s32.totalorder %s1240_s27, %s985_s25  ;;  %p994_p5 = scmp.lt.s32.totalorder %s985_s25, %s985_s25 }
  0x36   : > { %p988_p8 = pnand %p986_p6, %p1252_p13  ;;  %p995_p7 = por %p994_p5, %p993_p3 }
  0x38   : > { %p989_p0 = pneg %p988_p8 }
  0x3a   : > { %p996_p10 = pnand %p995_p7, %p989_p0 }
  0x3c   : > { %999 = shalt.err (!%p996_p10)
}
  0x3d   : > { %845 = dma.hbm_to_vmem [thread:$0]  (!%p1236_p11), %s1615_s2, 128, %s1240_s27, [#allocation6]  }
  0x3e   : > { %s1000_s14 = scalar_lea.hbm %s1616_s3, 512 }
  0x3f   : > { %p1001_p9 = scmp.ne.s32.totalorder %s1616_s3, %s1000_s14  ;;  %p1007_p1 = scmp.lt.u32.totalorder %s1000_s14, %s1616_s3 }
  0x41   : > { %p1003_p12 = pnand %p1001_p9, %p1252_p13 }
  0x43   : > { %p1004_p2 = pneg %p1003_p12 }
  0x45   : > { %p1009_p4 = pnand %p1007_p1, %p1004_p2 }
  0x47   : > { %1012 = shalt.err (!%p1009_p4)
}
  0x48   : > { %s1013_s27 = scalar_lea.vmem %s1242_s30, 512  ;;  %p1021_p3 = scmp.lt.s32.totalorder %s1242_s30, %s1242_s30 }
  0x49   : > { %p1014_p6 = scmp.ne.s32.totalorder %s1242_s30, %s1013_s27  ;;  %p1022_p5 = scmp.lt.s32.totalorder %s1013_s27, %s1013_s27 }
  0x4b   : > { %p1016_p8 = pnand %p1014_p6, %p1252_p13  ;;  %p1023_p7 = por %p1022_p5, %p1021_p3 }
  0x4d   : > { %p1017_p0 = pneg %p1016_p8 }
  0x4f   : > { %p1024_p10 = pnand %p1023_p7, %p1017_p0 }
  0x51   : > { %1027 = shalt.err (!%p1024_p10)
}
  0x52   : > { %s1137_s5 = smov 256   ;;  %s1138_s10 = smov 16  }
  0x53   : > { %848 = dma.hbm_to_vmem [thread:$0]  (!%p1236_p11), %s1616_s3, 512, %s1242_s30, [#allocation9], %s1137_s5, %s1137_s5, %s1138_s10  }
  0x54   : > { %s1315_s8 = sadd.s32 1, %s1132_s18   ;;  %s29_s9 = sadd.s32 1, %s1128_s17 }
  0x55   : > { %s26_s25 = ssub.s32 %s1132_s18, %s1315_s8  ;;  %p36_p9 = scmp.ne.s32.totalorder %s1128_s17, %s1124_s16 }
  0x56   : > { %p27_p13 = scmp.eq.s32.totalorder %s26_s25, 0  ;;  %p37_p12 = scmp.eq.s32.totalorder %s1132_s18, 0 }
  0x57   : > { %p860_p2 = scmp.lt.s32.totalorder %s1132_s18, 2  ;;  %p1626_p4 = scmp.eq.s32.totalorder %s1208_s19, 1 }
  0x58   : > { %s1325_s11 = scalar_select %p27_p13, %s1128_s17, %s29_s9  }
  0x59   : > { %p38_p1 = por %p37_p12, %p36_p9  ;;  %p1329_p6 = por %p1626_p4, %p36_p9 }
  0x5a   : > { %s190_s28 = sand.u32 1, %s1128_s17   ;;  %s805_s13 = sshll.u32 %s1132_s18, 7 }
  0x5b   : > { %s789_s30 = sshll.u32 %s190_s28, 3  ;;  %s1338_s24 = scalar_lea.hbm %s1613_s0, %s805_s13 }
  0x5c   : > { %s194_s26 = scalar_lea.vmem [#allocation2], %s789_s30  ;;  %p1340_p11 = pnand %p860_p2, %p38_p1 }
  0x5d   : > { %s202_s29 = sshll.u32 %s194_s26, 4  ;;  %s191_s5 = scalar_lea.sflag [#allocation3], %s190_s28  ;;  %s1344_s29 = int_to_ptr.vmem [resolvable:$true] %s202_s29 }
  0x5e   : > { %s1028_s10 = scalar_lea.hbm %s1338_s24, 128  ;;  %p1030_p0 = pneg %p1340_p11 }
  0x5f   : > { %p1029_p8 = scmp.ne.s32.totalorder %s1338_s24, %s1028_s10  ;;  %s1033_s25 = scalar_lea.hbm %s1613_s0, 256 }
  0x60   : > { %p1034_p7 = scmp.lt.u32.totalorder %s1338_s24, %s1613_s0  ;;  %p1035_p10 = scmp.lt.u32.totalorder %s1033_s25, %s1028_s10 }
  0x61   : > { %p1031_p3 = pnand %p1030_p0, %p1029_p8  ;;  %p1037_p9 = scmp.lt.u32.totalorder %s1028_s10, %s1338_s24 }
  0x62   : > { %p1036_p13 = por %p1035_p10, %p1034_p7 }
  0x63   : > { %p1032_p5 = pneg %p1031_p3 }
  0x64   : > { %p1038_p12 = por %p1037_p9, %p1036_p13 }
  0x66   : > { %p1039_p2 = pnand %p1038_p12, %p1032_p5 }
  0x68   : > { %1042 = shalt.err (!%p1039_p2)
}
  0x69   : > { %s1043_s28 = scalar_lea.vmem %s1344_s29, 128  ;;  %s1139_s30 = smov [#allocation2]  }
  0x6a   : > { %p1044_p1 = scmp.ne.s32.totalorder %s1344_s29, %s1043_s28  ;;  %s1048_s14 = sshll.u32 %s1139_s30, 4  ;;  %s1049_s14 = int_to_ptr.vmem [resolvable:$false] %s1048_s14 }
  0x6b   : > { %s1050_s20 = scalar_lea.vmem %s1049_s14, 256  ;;  %p1051_p3 = scmp.lt.s32.totalorder %s1344_s29, %s1049_s14 }
  0x6c   : > { %p1046_p4 = pnand %p1044_p1, %p1030_p0  ;;  %p1052_p7 = scmp.lt.s32.totalorder %s1050_s20, %s1043_s28 }
  0x6e   : > { %p1047_p8 = pneg %p1046_p4  ;;  %p1053_p10 = por %p1052_p7, %p1051_p3 }
  0x70   : > { %p1054_p13 = pnand %p1053_p10, %p1047_p8 }
  0x72   : > { %1057 = shalt.err (!%p1054_p13)
}
  0x73   : > { %852 = dma.hbm_to_vmem [thread:$0]  (!%p1340_p11), %s1338_s24, 128, %s1344_s29, %s191_s5  }
  0x74   : > { %p1629_p5 = scmp.ne.s32.totalorder %s1623_s23, 0 }
  0x75   : > { %s1374_s26 = sand.u32 (!%p1629_p5), 1, %s1124_s16   ;;  %p1630_p0 = scmp.ne.s32.totalorder (!%p1629_p5), %s1621_s21, 0 }
  0x76   : > { %211 = sbr.rel (%p1629_p5) target bundleno = 712 (0x2c8), region = 36  ;;  %s793_s10 = sshll.u32 (!%p1629_p5), %s1374_s26, 3 }
  0x77   : > { %s214_s6 = scalar_lea.sflag (!%p1629_p5), [#allocation3], %s1374_s26  ;;  %s217_s7 = scalar_lea.vmem (!%p1629_p5), [#allocation2], %s793_s10 }
  0x7d   : > { %1103 = dma.done.wait (%p1630_p0), %s214_s6, 128  }
  0x7e   : > { %1105 = vsyncadd (%p1630_p0), %s214_s6, 4294967168  ;;  %p1631_p9 = scmp.eq.s32.totalorder %s1208_s19, 0 }
  0x80   : > { %1107 = dma.done.wait (%p1631_p9), [#allocation6], 192   ;;  %p1632_p11 = pmov %p1631_p9 }
  0x81   : > { %p1633_p12 = pmov %p1631_p9 }
  0x82   : > { %1109 = vsyncadd (%p1632_p11), [#allocation6], 4294967104 }
  0x83   : > { %1111 = dma.done.wait (%p1633_p12), [#allocation9], 512   ;;  %p1634_p2 = pmov %p1631_p9 }
  0x84   : > { %v1140_v0 = vmov 2   ;;  %v1141_v1 = vmov 0   ;;  %v1392_v2 = vld [vmem:[#allocation5] sm:$0xf]  ;;  %v1142_v3 = vmov 3   ;;  %v1143_v4 = vmov 1  }
  0x85   : > { %1113 = vsyncadd (%p1634_p2), [#allocation9], 4294966784  ;;  %925 = vset.pattern.permute.xlu1 %v1140_v0  ;;  %923 = vset.pattern.permute.xlu0 %v1141_v1  ;;  %v1400_v5 = vld [vmem:[%s217_s7] sm:$0xff]  ;;  %v1144_v6 = vmov 4   ;;  %s1145_s21 = smov 17   ;;  %v1146_v8 = vmov 5   ;;  %v268_v24 = vlaneseq }
  0x86   : > { %325 = vperm.xlu1 %925, %v1392_v2   ;;  %275 = vperm.xlu0 %923, %v1392_v2   ;;  %v262_v7 = vcombine.high %v1400_v5, %v1400_v5  ;;  %s1147_s23 = smov 16   ;;  %v1148_v9 = vmov 8   ;;  %v1149_v10 = vmov 6   ;;  %s1150_s24 = smov 15   ;;  %v1151_v11 = vmov 7   ;;  %v1433_v33 = vld [vmem:[#allocation8] sm:$0xff] }
  0x87   : > { %s1152_s29 = smov 1   ;;  %s1153_s27 = smov 127   ;;  %v1156_v12 = vmov 9   ;;  %v1425_v27 = vshrl.u32 %v268_v24, 7  ;;  %v1158_v28 = vmov 839922192  }
  0x88   : > { %s1154_s5 = smov 113   ;;  %s1155_s25 = smov 112   ;;  %v371_v29 = vunpack.c.l.s4 %v1158_v28  ;;  %v1440_v36 = vld [vmem:[#allocation8 + $0x8] sm:$0xff]  ;;  %v1445_v39 = vand.u32 127, %v268_v24  ;;  %vm490_vm8 = vcmask 1043456  }
  0x89   : > { %s1157_s9 = smov 111   ;;  %v1428_v30 = vsub.s32 1, %v1425_v27  ;;  %v1431_v32 = vsub.s32 2, %v1425_v27  ;;  %v1436_v34 = vsub.s32 0, %v1425_v27  ;;  %v1443_v37 = vsub.s32 3, %v1425_v27 }
  0x8a   : > { %926 = vset.pattern.permute.xlu1 %v1142_v3  ;;  %924 = vset.pattern.permute.xlu0 %v1143_v4  ;;  %v372_v38 = vunpack.c.0.s8 %v371_v29  ;;  %vm296_vm0 = vcmp.lt.s32.totalorder %v1445_v39, 16  ;;  %vm270_vm1 = vcmp.lt.s32.totalorder %v1445_v39, 17  ;;  %vm321_vm2 = vcmp.lt.s32.totalorder %v1445_v39, 15 }
  0x8b   : > { %350 = vperm.xlu1 %926, %v1392_v2   ;;  %300 = vperm.xlu0 %924, %v1392_v2   ;;  %v306_v40 = vrot.slane %v1433_v33, %v1428_v30  ;;  %v310_v41 = vrot.slane %v1440_v36, %v1428_v30  ;;  %v331_v43 = vrot.slane %v1433_v33, %v1431_v32  ;;  %v397_v52 = vsub.s32 5, %v1425_v27 }
  0x8c   : > { %v335_v44 = vrot.slane %v1440_v36, %v1431_v32  ;;  %v281_v45 = vrot.slane %v1433_v33, %v1436_v34  ;;  %v285_v46 = vrot.slane %v1440_v36, %v1436_v34  ;;  %v356_v47 = vrot.slane %v1433_v33, %v1443_v37 }
  0x8d   : > { %v360_v48 = vrot.slane %v1440_v36, %v1443_v37  ;;  %v375_v49 = vsub.s32 %v372_v38, %v1425_v27  ;;  %v422_v57 = vsub.s32 6, %v1425_v27  ;;  %vm346_vm3 = vcmp.lt.s32.totalorder %v1445_v39, 1 }
  0x8e   : > { %v447_v61 = vsub.s32 7, %v1425_v27  ;;  %vm388_vm4 = vcmp.lt.s32.totalorder %v1445_v39, 127  ;;  %vm413_vm5 = vcmp.lt.s32.totalorder %v1445_v39, 113  ;;  %vm438_vm6 = vcmp.lt.s32.totalorder %v1445_v39, 112 }
  0x8f   : > { %927 = vset.pattern.permute.xlu1 %v1144_v6  ;;  %264 = vrot.lane.b32.xlu0 %v1400_v5, %s1145_s21  ;;  %vm463_vm7 = vcmp.lt.s32.totalorder %v1445_v39, 111  ;;  %vm518_vm9 = vcmp.lt.s32.totalorder %v1425_v27, 1  ;;  %vm537_vm10 = vcmp.ge.s32.totalorder %v1425_v27, 1  ;;  %vm538_vm11 = vcmp.lt.s32.totalorder %v1425_v27, 2 }
  0x90   : > { %368 = vperm.xlu1 %927, %v1392_v2   ;;  %928 = vset.pattern.permute.xlu0 %v1146_v8  ;;  %vm555_vm12 = vcmp.ge.s32.totalorder %v1425_v27, 2  ;;  %vm556_vm13 = vcmp.lt.s32.totalorder %v1425_v27, 3  ;;  %vm1528_vm14 = vmand %vm537_vm10, %vm538_vm11  ;;  %vm573_vm15 = vcmp.ge.s32.totalorder %v1425_v27, 3 }
  0x93   : > { %292 = vrot.lane.b32.xlu0 %v1400_v5, %s1147_s23 }
  0x94   : > { %266 = vrot.lane.b32.xlu1 %v262_v7, %s1145_s21  ;;  %s797_s21 = sshll.u32 %s1374_s26, 4 }
  0x95   : > { %931 = vset.pattern.permute.xlu1 %v1148_v9 }
  0x97   : > { %392 = vperm.xlu0 %928, %v1392_v2  }
  0x98   : > { %294 = vrot.lane.b32.xlu1 %v262_v7, %s1147_s23  ;;  %s806_s23 = sshll.u32 %s1208_s19, 8 }
  0x9b   : > { %929 = vset.pattern.permute.xlu0 %v1149_v10 }
  0x9c   : > { %317 = vrot.lane.b32.xlu1 %v1400_v5, %s1150_s24  ;;  %417 = vperm.xlu0 %929, %v1392_v2  }
  0xa0   : > { %319 = vrot.lane.b32.xlu1 %v262_v7, %s1150_s24  ;;  %930 = vset.pattern.permute.xlu0 %v1151_v11  ;;  %s253_s24 = scalar_lea.vmem [#allocation10], %s797_s21 }
  0xa1   : > { %442 = vperm.xlu0 %930, %v1392_v2  }
  0xa4   : > { %342 = vrot.lane.b32.xlu1 %v1400_v5, %s1152_s29 }
  0xa5   : > { %386 = vrot.lane.b32.xlu0 %v262_v7, %s1153_s27 }
  0xa8   : > { %344 = vrot.lane.b32.xlu1 %v262_v7, %s1152_s29  ;;  %s684_s29 = sshll.u32 %s253_s24, 4  ;;  %s1571_s29 = int_to_ptr.vmem [resolvable:$true] %s684_s29 }
  0xa9   : > { %411 = vrot.lane.b32.xlu0 %v262_v7, %s1154_s5  ;;  %s1058_s19 = scalar_lea.vmem %s1571_s29, 256 }
  0xaa   : > { %p1059_p1 = scmp.ne.s32.totalorder %s1571_s29, %s1058_s19 }
  0xac   : > { %467 = vperm.xlu1 %931, %v1392_v2   ;;  %p1060_p4 = pnand %p1059_p1, %p1329_p6 }
  0xad   : > { %436 = vrot.lane.b32.xlu0 %v262_v7, %s1155_s25 }
  0xae   : > { %p1061_p8 = pneg %p1060_p4 }
  0xb0   : > { %384 = vrot.lane.b32.xlu1 %v1400_v5, %s1153_s27 }
  0xb1   : > { %932 = vset.pattern.permute.xlu1 %v1156_v12  ;;  %459 = vrot.lane.b32.xlu0 %v1400_v5, %s1157_s9 }
  0xb4   : > { %409 = vrot.lane.b32.xlu1 %v1400_v5, %s1154_s5 }
  0xb8   : > { %434 = vrot.lane.b32.xlu1 %v1400_v5, %s1155_s25  ;;  %s1569_s25 = scalar_lea.hbm %s1617_s4, %s806_s23 }
  0xbc   : > { %485 = vperm.xlu1 %932, %v1392_v2  }
  0xc0   : > { %461 = vrot.lane.b32.xlu1 %v262_v7, %s1157_s9  ;;  %s670_s9 = scalar_lea.sflag [#allocation4], %s1374_s26 }
 0x105   : > { %v326_v13 = vpop.permute.xlu1 %325  ;;  %v276_v14 = vpop.permute.xlu0 %275 }
 0x106   : > { %v336_v58 = vmul.f32 %v331_v43, %v326_v13  ;;  %v286_v59 = vmul.f32 %v281_v45, %v276_v14  ;;  %v287_v60 = vmul.f32 %v285_v46, %v276_v14  ;;  %v337_v9 = vmul.f32 %v335_v44, %v326_v13 }
 0x107   : > { %v398_v13 = vrot.slane %v1433_v33, %v397_v52  ;;  %v448_v46 = vrot.slane %v1433_v33, %v447_v61 }
 0x10a   : > { %v351_v15 = vpop.permute.xlu1 %350  ;;  %v301_v16 = vpop.permute.xlu0 %300 }
 0x10b   : > { %v311_v50 = vmul.f32 %v306_v40, %v301_v16  ;;  %v312_v51 = vmul.f32 %v310_v41, %v301_v16  ;;  %v361_v10 = vmul.f32 %v356_v47, %v351_v15  ;;  %v452_v47 = vrot.slane %v1440_v36, %v447_v61 }
 0x10e   : > { %v265_v18 = vpop.permute.xlu0 %264 }
 0x10f   : > { %v1419_v17 = vpop.permute.xlu1 %368 }
 0x112   : > { %v293_v20 = vpop.permute.xlu0 %292 }
 0x113   : > { %v267_v19 = vpop.permute.xlu1 %266 }
 0x114   : > { %v271_v62 = vsel %vm270_vm1, %v265_v18, %v267_v19  ;;  %v272_v63 = vsel %vm270_vm1, %v267_v19, %v265_v18  ;;  %vm574_vm1 = vcmp.lt.s32.totalorder %v1425_v27, 4 }
 0x115   : > { %v288_v28 = vmul.f32 %v286_v59, %v272_v63  ;;  %v289_v29 = vmul.f32 %v287_v60, %v271_v62 }
 0x116   : > { %v1421_v22 = vpop.permute.xlu0 %392 }
 0x117   : > { %v295_v21 = vpop.permute.xlu1 %294 }
 0x118   : > { %v297_v55 = vsel %vm296_vm0, %v293_v20, %v295_v21  ;;  %v298_v56 = vsel %vm296_vm0, %v295_v21, %v293_v20  ;;  %v362_v20 = vmul.f32 %v360_v48, %v351_v15  ;;  %v376_v21 = vrot.slane %v1419_v17, %v375_v49  ;;  %vm1535_vm0 = vmand %vm555_vm12, %vm556_vm13 }
 0x119   : > { %v313_v11 = vmul.f32 %v311_v50, %v298_v56  ;;  %v314_v12 = vmul.f32 %v312_v51, %v297_v55  ;;  %v403_v50 = vmul.f32 %v398_v13, %v1421_v22 }
 0x11a   : > { %v378_v43 = vmul.f32 %v376_v21, %v1400_v5 }
 0x11b   : > { %v318_v23 = vpop.permute.xlu1 %317  ;;  %v1423_v26 = vpop.permute.xlu0 %417  ;;  %v315_v15 = vadd.f32 %v313_v11, %v288_v28 }
 0x11f   : > { %v320_v25 = vpop.permute.xlu1 %319 }
 0x120   : > { %v1438_v35 = vpop.permute.xlu0 %442  ;;  %v322_v7 = vsel %vm321_vm2, %v318_v23, %v320_v25  ;;  %v323_v8 = vsel %vm321_vm2, %v320_v25, %v318_v23  ;;  %v402_v23 = vrot.slane %v1440_v36, %v397_v52  ;;  %v316_v25 = vadd.f32 %v314_v12, %v289_v29  ;;  %v798_v12 = vld [vmem:[#allocation8 + $0x10] ss:$0 sm:$0xff]  ;;  %vm575_vm2 = vmand %vm573_vm15, %vm574_vm1 }
 0x121   : > { %v338_v38 = vmul.f32 %v336_v58, %v323_v8  ;;  %v339_v18 = vmul.f32 %v337_v9, %v322_v7  ;;  %v454_v62 = vmul.f32 %v452_v47, %v1438_v35 }
 0x122   : > { %v404_v5 = vmul.f32 %v402_v23, %v1421_v22 }
 0x123   : > { %v343_v31 = vpop.permute.xlu1 %342  ;;  %v340_v44 = vadd.f32 %v338_v38, %v315_v15  ;;  %v341_v45 = vadd.f32 %v339_v18, %v316_v25 }
 0x124   : > { %v387_v54 = vpop.permute.xlu0 %386 }
 0x127   : > { %v345_v42 = vpop.permute.xlu1 %344 }
 0x128   : > { %v347_v14 = vsel %vm346_vm3, %v343_v31, %v345_v42  ;;  %v348_v24 = vsel %vm346_vm3, %v345_v42, %v343_v31  ;;  %v412_v19 = vpop.permute.xlu0 %411  ;;  %v423_v31 = vrot.slane %v1433_v33, %v422_v57  ;;  %v427_v42 = vrot.slane %v1440_v36, %v422_v57 }
 0x129   : > { %v363_v17 = vmul.f32 %v361_v10, %v348_v24  ;;  %v364_v40 = vmul.f32 %v362_v20, %v347_v14  ;;  %v380_v57 = vcombine.high %v378_v43, %v378_v43 }
 0x12a   : > { %v428_v33 = vmul.f32 %v423_v31, %v1423_v26  ;;  %v429_v60 = vmul.f32 %v427_v42, %v1423_v26 }
 0x12b   : > { %v1468_v53 = vpop.permute.xlu1 %467  ;;  %v365_v51 = vadd.f32 %v363_v17, %v340_v44  ;;  %v366_v52 = vadd.f32 %v364_v40, %v341_v45 }
 0x12c   : > { %v437_v55 = vpop.permute.xlu0 %436  ;;  %v478_v24 = vmul.f32 %v798_v12, %v1468_v53 }
 0x12d   : > { %v382_v7 = vadd.f32 %v378_v43, %v365_v51  ;;  %v383_v8 = vadd.f32 %v380_v57, %v366_v52 }
 0x12f   : > { %v385_v16 = vpop.permute.xlu1 %384 }
 0x130   : > { %v389_v48 = vsel %vm388_vm4, %v385_v16, %v387_v54  ;;  %v390_v49 = vsel %vm388_vm4, %v387_v54, %v385_v16  ;;  %v453_v54 = vmul.f32 %v448_v46, %v1438_v35  ;;  %v799_v16 = vld [vmem:[#allocation8 + $0x18] ss:$0 sm:$0xff]  ;;  %v460_v35 = vpop.permute.xlu0 %459 }
 0x131   : > { %v405_v36 = vmul.f32 %v403_v50, %v389_v48  ;;  %v406_v61 = vmul.f32 %v404_v5, %v390_v49  ;;  %v479_v28 = vmul.f32 %v799_v16, %v1468_v53  ;;  %v1159_v49 = vmov 11   ;;  %v256_v5 = vld [vmem:[#allocation7] sm:$0xff] }
 0x132   : > { %934 = vset.pattern.permute.xlu1 %v1159_v49  ;;  %v1160_v50 = vmov 10  }
 0x133   : > { %v410_v41 = vpop.permute.xlu1 %409  ;;  %v407_v26 = vadd.f32 %v405_v36, %v382_v7  ;;  %v408_v20 = vadd.f32 %v406_v61, %v383_v8  ;;  %933 = vset.pattern.permute.xlu0 %v1160_v50 }
 0x134   : > { %v414_v58 = vsel %vm413_vm5, %v410_v41, %v412_v19  ;;  %v415_v59 = vsel %vm413_vm5, %v412_v19, %v410_v41 }
 0x135   : > { %v430_v9 = vmul.f32 %v428_v33, %v414_v58  ;;  %v431_v10 = vmul.f32 %v429_v60, %v415_v59 }
 0x137   : > { %v435_v56 = vpop.permute.xlu1 %434  ;;  %v432_v29 = vadd.f32 %v430_v9, %v407_v26  ;;  %v433_v38 = vadd.f32 %v431_v10, %v408_v20 }
 0x138   : > { %v439_v22 = vsel %vm438_vm6, %v435_v56, %v437_v55  ;;  %v440_v63 = vsel %vm438_vm6, %v437_v55, %v435_v56 }
 0x139   : > { %v455_v21 = vmul.f32 %v453_v54, %v439_v22  ;;  %v456_v14 = vmul.f32 %v454_v62, %v440_v63 }
 0x13b   : > { %v486_v11 = vpop.permute.xlu1 %485  ;;  %v457_v23 = vadd.f32 %v455_v21, %v432_v29  ;;  %v458_v15 = vadd.f32 %v456_v14, %v433_v38 }
 0x13f   : > { %v462_v18 = vpop.permute.xlu1 %461 }
 0x140   : > { %v464_v19 = vsel %vm463_vm7, %v460_v35, %v462_v18  ;;  %v465_v13 = vsel %vm463_vm7, %v462_v18, %v460_v35 }
 0x141   : > { %v480_v25 = vmul.f32 %v478_v24, %v464_v19  ;;  %v481_v17 = vmul.f32 %v479_v28, %v465_v13 }
 0x143   : > { %v482_v40 = vadd.f32 %v480_v25, %v457_v23  ;;  %v483_v39 = vadd.f32 %v481_v17, %v458_v15 }
 0x145   : > { %v1505_v41 = vadd.f32 %v486_v11, %v482_v40  ;;  %v1507_v43 = vadd.f32 %v486_v11, %v483_v39 }
 0x147   : > { %v491_v31 = vsel %vm490_vm8, %v1505_v41, 0.0  ;;  %v492_v53 = vsel %vm490_vm8, %v1507_v43, 0.0  ;;  %v496_v42 = vmul.f32 %v1505_v41, %v1505_v41  ;;  %v497_v44 = vmul.f32 %v1507_v43, %v1507_v43 }
 0x148   : > { %v493_v45 = vadd.f32 %v492_v53, %v491_v31 }
 0x149   : > { %v498_v46 = vsel %vm490_vm8, %v496_v42, 0.0  ;;  %v499_v47 = vsel %vm490_vm8, %v497_v44, 0.0 }
 0x14a   : > { %494 = vadd.xlane.f32.xlu0 %v493_v45  ;;  %v500_v48 = vadd.f32 %v499_v47, %v498_v46 }
 0x14c   : > { %501 = vadd.xlane.f32.xlu1 %v500_v48 }
 0x15d   : > { %591 = vperm.xlu1 %934, %v1392_v2  }
 0x161   : > { %935 = vset.pattern.permute.xlu1 %v1141_v1 }
 0x162   : > { %598 = vperm.xlu1 %935, %v256_v5  }
 0x166   : > { %936 = vset.pattern.permute.xlu1 %v1143_v4 }
 0x167   : > { %614 = vperm.xlu1 %936, %v256_v5  }
 0x16b   : > { %937 = vset.pattern.permute.xlu1 %v1140_v0 }
 0x16c   : > { %630 = vperm.xlu1 %937, %v256_v5  }
 0x170   : > { %938 = vset.pattern.permute.xlu1 %v1142_v3 }
 0x171   : > { %646 = vperm.xlu1 %938, %v256_v5  }
 0x175   : > { %939 = vset.pattern.permute.xlu1 %v1144_v6 }
 0x176   : > { %662 = vperm.xlu1 %939, %v256_v5  }
 0x1d7   : > { %v495_v51 = vpop.xlane.xlu0 %494 }
 0x1d8   : > { %807 = vpush %v495_v51  ;;  %v523_v52 = vrot.slane %v495_v51, 1  ;;  %v542_v57 = vrot.slane %v495_v51, 2  ;;  %v560_v0 = vrot.slane %v495_v51, 3 }
 0x1d9   : > { %v502_v55 = vpop.xlane.xlu1 %501 }
 0x1da   : > { %809 = vpush %v502_v55  ;;  %v528_v56 = vrot.slane %v502_v55, 1  ;;  %v546_v1 = vrot.slane %v502_v55, 2  ;;  %v564_v4 = vrot.slane %v502_v55, 3 }
 0x1db   : > { %811 = vpush %v523_v52 }
 0x1dc   : > { %813 = vpush %v528_v56 }
 0x1dd   : > { %815 = vpush %v542_v57  ;;  %v592_v45 = vpop.permute.xlu1 %591 }
 0x1de   : > { %817 = vpush %v546_v1 }
 0x1df   : > { %819 = vpush %v560_v0 }
 0x1e0   : > { %821 = vpush %v564_v4 }
 0x1e1   : > { %v599_v46 = vpop.permute.xlu1 %598 }
 0x1e6   : > { %v615_v47 = vpop.permute.xlu1 %614 }
 0x1eb   : > { %v631_v52 = vpop.permute.xlu1 %630 }
 0x209   : > { %s808_s13 = spop %807 }
 0x20a   : > { %v507_v3 = vstv %s808_s13  ;;  %s1161_s13 = smov [#allocation10]  }
 0x20b   : > { %v512_v58 = vmul.f32 0.00390625, %v507_v3  ;;  %s810_s28 = spop %809 }
 0x20c   : > { %v510_v59 = vstv %s810_s28  ;;  %s812_s30 = spop %811  ;;  %s1062_s28 = sshll.u32 %s1161_s13, 4  ;;  %s1063_s28 = int_to_ptr.vmem [resolvable:$false] %s1062_s28 }
 0x20d   : > { %v514_v33 = vmul.f32 %v512_v58, %v512_v58  ;;  %v520_v60 = vsel %vm518_vm9, %v512_v58, 0.0  ;;  %v513_v36 = vmul.f32 0.00390625, %v510_v59  ;;  %v526_v61 = vstv %s812_s30  ;;  %s814_s14 = spop %813  ;;  %s1064_s30 = scalar_lea.vmem %s1063_s28, 512 }
 0x20e   : > { %v532_v62 = vmul.f32 0.00390625, %v526_v61  ;;  %v531_v22 = vstv %s814_s14  ;;  %s816_s20 = spop %815  ;;  %p1065_p3 = scmp.lt.s32.totalorder %s1571_s29, %s1063_s28 }
 0x20f   : > { %v515_v63 = vsub.f32 %v513_v36, %v514_v33  ;;  %v533_v7 = vmul.f32 0.00390625, %v531_v22  ;;  %v545_v8 = vstv %s816_s20  ;;  %s818_s10 = spop %817  ;;  %p1066_p7 = scmp.lt.s32.totalorder %s1064_s30, %s1058_s19 }
 0x210   : > { %v534_v10 = vmul.f32 %v532_v62, %v532_v62  ;;  %v540_v11 = vsel %vm1528_vm14, %v532_v62, %v520_v60  ;;  %v550_v12 = vmul.f32 0.00390625, %v545_v8  ;;  %v549_v16 = vstv %s818_s10  ;;  %s820_s6 = spop %819  ;;  %v647_v60 = vpop.permute.xlu1 %646 }
 0x211   : > { %v516_v26 = vmax.f32 %v515_v63, 0.0  ;;  %v551_v20 = vmul.f32 0.00390625, %v549_v16  ;;  %v563_v21 = vstv %s820_s6  ;;  %s822_s7 = spop %821  ;;  %p1067_p10 = por %p1066_p7, %p1065_p3 }
 0x212   : > { %v535_v14 = vsub.f32 %v533_v7, %v534_v10  ;;  %v552_v35 = vmul.f32 %v550_v12, %v550_v12  ;;  %v558_v24 = vsel %vm1535_vm0, %v550_v12, %v540_v11  ;;  %v568_v28 = vmul.f32 0.00390625, %v563_v21 }
 0x213   : > { %v521_v29 = vsel %vm518_vm9, %v516_v26, 0.0  ;;  %v567_v38 = vstv %s822_s7  ;;  %p1068_p13 = pnand %p1067_p10, %p1061_p8 }
 0x214   : > { %v536_v18 = vmax.f32 %v535_v14, 0.0  ;;  %v553_v19 = vsub.f32 %v551_v20, %v552_v35  ;;  %v570_v13 = vmul.f32 %v568_v28, %v568_v28  ;;  %v569_v23 = vmul.f32 0.00390625, %v567_v38  ;;  %v663_v63 = vpop.permute.xlu1 %662 }
 0x215   : > { %v576_v15 = vsel %vm575_vm2, %v568_v28, %v558_v24 }
 0x216   : > { %v541_v25 = vsel %vm1528_vm14, %v536_v18, %v521_v29  ;;  %v554_v17 = vmax.f32 %v553_v19, 0.0  ;;  %v571_v40 = vsub.f32 %v569_v23, %v570_v13  ;;  %v580_v48 = vsub.f32 %v1505_v41, %v576_v15 }
 0x217   : > { %v581_v49 = vsub.f32 %v1507_v43, %v576_v15 }
 0x218   : > { %v559_v39 = vsel %vm1535_vm0, %v554_v17, %v541_v25  ;;  %v572_v31 = vmax.f32 %v571_v40, 0.0 }
 0x21a   : > { %v577_v53 = vsel %vm575_vm2, %v572_v31, %v559_v39 }
 0x21b   : > { %v578_v42 = vadd.f32 1e-05, %v577_v53 }
 0x21d   : > { %942 = vrsqrt.f32 %v578_v42 }
 0x227   : > { %v943_v27 = vpop.eup %942 }
 0x228   : > { %v582_v44 = vmul.f32 %v943_v27, %v1392_v2 }
 0x22a   : > { %585 = vperm.xlu0 %933, %v582_v44  }
 0x22e   : > { %940 = vset.pattern.permute.xlu0 %v1144_v6 }
 0x2a9   : > { %v586_v50 = vpop.permute.xlu0 %585 }
 0x2aa   : > { %v588_v5 = vmul.f32 %v586_v50, %v580_v48  ;;  %v589_v51 = vmul.f32 %v586_v50, %v581_v49 }
 0x2ac   : > { %v594_v55 = vadd.f32 %v592_v45, %v588_v5  ;;  %v595_v56 = vadd.f32 %v592_v45, %v589_v51 }
 0x2ae   : > { %v604_v1 = vrot.slane %v594_v55, %v1436_v34  ;;  %v608_v2 = vrot.slane %v595_v56, %v1436_v34  ;;  %v620_v6 = vrot.slane %v594_v55, %v1428_v30  ;;  %v624_v57 = vrot.slane %v595_v56, %v1428_v30 }
 0x2af   : > { %v636_v4 = vrot.slane %v594_v55, %v1431_v32  ;;  %v640_v41 = vrot.slane %v595_v56, %v1431_v32  ;;  %v652_v43 = vrot.slane %v594_v55, %v1443_v37  ;;  %v656_v0 = vrot.slane %v595_v56, %v1443_v37 }
 0x2b0   : > { %v609_v3 = vmul.f32 %v604_v1, %v599_v46  ;;  %v610_v58 = vmul.f32 %v608_v2, %v599_v46  ;;  %v625_v59 = vmul.f32 %v620_v6, %v615_v47  ;;  %v626_v33 = vmul.f32 %v624_v57, %v615_v47 }
 0x2b1   : > { %v641_v61 = vmul.f32 %v636_v4, %v631_v52  ;;  %v642_v54 = vmul.f32 %v640_v41, %v631_v52  ;;  %v657_v22 = vmul.f32 %v652_v43, %v647_v60  ;;  %v658_v32 = vmul.f32 %v656_v0, %v647_v60 }
 0x2b2   : > { %v627_v34 = vadd.f32 %v625_v59, %v609_v3  ;;  %v628_v36 = vadd.f32 %v626_v33, %v610_v58 }
 0x2b4   : > { %v643_v30 = vadd.f32 %v641_v61, %v627_v34  ;;  %v644_v62 = vadd.f32 %v642_v54, %v628_v36 }
 0x2b6   : > { %v659_v37 = vadd.f32 %v657_v22, %v643_v30  ;;  %v660_v7 = vadd.f32 %v658_v32, %v644_v62 }
 0x2b8   : > { %v665_v8 = vadd.f32 %v663_v63, %v659_v37  ;;  %v666_v9 = vadd.f32 %v663_v63, %v660_v7 }
 0x2ba   : > { %667 = vst [vmem:[%s253_s24] sm:$0xff] %v665_v8  ;;  %668 = vst [vmem:[%s253_s24 + $0x8] sm:$0xff] %v666_v9 }
 0x2bb   : > { %1071 = shalt.err (!%p1068_p13)
}
 0x2bc   : > { %s1072_s26 = scalar_lea.hbm %s1569_s25, 256  ;;  %s1076_s10 = scalar_lea.hbm %s1617_s4, 512 }
 0x2bd   : > { %p1073_p5 = scmp.ne.s32.totalorder %s1569_s25, %s1072_s26  ;;  %p1077_p11 = scmp.lt.u32.totalorder %s1569_s25, %s1617_s4 }
 0x2be   : > { %p1078_p12 = scmp.lt.u32.totalorder %s1076_s10, %s1072_s26  ;;  %p1080_p1 = scmp.lt.u32.totalorder %s1072_s26, %s1569_s25 }
 0x2bf   : > { %p1074_p0 = pnand %p1073_p5, %p1329_p6 }
 0x2c0   : > { %p1079_p2 = por %p1078_p12, %p1077_p11 }
 0x2c1   : > { %p1075_p9 = pneg %p1074_p0 }
 0x2c2   : > { %p1081_p4 = por %p1080_p1, %p1079_p2 }
 0x2c4   : > { %p1082_p8 = pnand %p1081_p4, %p1075_p9 }
 0x2c6   : > { %1085 = shalt.err (!%p1082_p8)
}
 0x2c7   : > { %837 = dma.vmem_to_hbm [thread:$0]  (%p1329_p6), %s1571_s29, 256, %s1569_s25, %s670_s9  }
 0x2c8 PF: > { %s696_s21 = sand.u32 1, %s1120_s15   ;;  %p1639_p3 = scmp.ne.s32.totalorder %s1622_s22, 0 }
 0x2c9   : > { %p1640_p7 = scmp.ge.s32.totalorder %s1132_s18, 2  ;;  %s697_s23 = scalar_lea.sflag [#allocation4], %s696_s21 }
 0x2cb   : > { %p854_p10 = pnand %p1640_p7, %p1639_p3 }
 0x2cd   : > { %1115 = dma.done.wait (!%p854_p10), %s697_s23, 256  }
 0x2ce   : > { %1117 = vsyncadd (!%p854_p10), %s697_s23, 4294967040  ;;  %p19_p13 = scmp.ge.s32.totalorder %s1315_s8, 4   ;;  %s1641_s15 = smov %s1124_s16 }
 0x2cf   : > { %s1642_s16 = smov %s1128_s17  ;;  %s1643_s17 = smov %s1325_s11 }
 0x2d0   : > { %s1644_s18 = smov %s1315_s8  ;;  %21 = sbr.rel (!%p19_p13) target bundleno = 7 (0x7), region = 93 }
 0x2d7   :  { %702 = vsyncpa [#allocation3], 1 }
 0x2d8   :  { %704 = vsyncpa [#allocation3 + $0x1], 1 }
 0x2d9   :  { %705 = vsyncpa [#allocation6], 1 }
 0x2da   :  { %706 = vsyncpa [#allocation9], 1 }
 0x2db   :  { %707 = vsyncpa [#allocation4], 1 }
 0x2dc   :  { %709 = vsyncpa [#allocation4 + $0x1], 1 }

</bundles_post_ra>
